<compile_context>
chip_gen: v7x
topology: tpu7x:2x2x1
jax: 0.10.0
libtpu: 0.0.40
codegen_flags: <defaults>
</compile_context>

<pallas_src>
import functools

import jax
import jax.numpy as jnp
from jax.experimental import pallas as pl
from jax.experimental.pallas import tpu as pltpu

_LANES = 128            # vreg lane width (fast axis)
_MAX_BLOCK_ROWS = 2048  # 2048 * 128 * 4B = 1 MiB per operand tile per step
_PAD_LOGIT = -1e30      # sigmoid(_PAD_LOGIT) == 0.0 in f32 -> padded tail is inert


def _round_up(x, m):
    return ((x + m - 1) // m) * m


def _sigmoid(x):
    # Explicit formula: exp -> EUP slot, add/div -> VPU.  Guaranteed lowering.
    return 1.0 / (1.0 + jnp.exp(-x))


def _dice_kernel(x_ref, t_ref, o_ref, inter_acc, pt_acc, *, smooth):
    i = pl.program_id(0)

    @pl.when(i == 0)
    def _init():
        inter_acc[...] = jnp.zeros_like(inter_acc)
        pt_acc[...] = jnp.zeros_like(pt_acc)

    x = x_ref[...]                      # (block_rows, 128) f32
    t = t_ref[...]                      # (block_rows, 128) f32

    p = _sigmoid(x)                     # padded tail: sigmoid(-1e30) == 0

    # Per-lane partial sums (sublane reduce only); cross-lane reduce deferred.
    inter_acc[...] += jnp.sum(p * t, axis=0, keepdims=True)
    pt_acc[...] += jnp.sum(p + t, axis=0, keepdims=True)

    @pl.when(i == pl.num_programs(0) - 1)
    def _finalize():
        inter = jnp.sum(inter_acc[...])
        pt_sum = jnp.sum(pt_acc[...])
        dice = (2.0 * inter + smooth) / (pt_sum + smooth)
        o_ref[...] = jnp.broadcast_to(1.0 - dice, o_ref.shape)


def dice_loss(inputs, targets, smooth=1.0):
    """Fused Pallas dice loss: returns the scalar 1 - dice."""
    x = jnp.ravel(inputs).astype(jnp.float32)
    t = jnp.ravel(targets).astype(jnp.float32)
    n = x.shape[0]

    rows = pl.cdiv(n, _LANES)
    block_rows = min(_MAX_BLOCK_ROWS, _round_up(rows, 8))
    rows_pad = _round_up(rows, block_rows)
    total = rows_pad * _LANES

    if total != n:
        # Pad logits with a huge negative value (sigmoid -> 0) and targets with
        # zero so no masking is needed inside the kernel.
        x = jnp.pad(x, (0, total - n), constant_values=_PAD_LOGIT)
        t = jnp.pad(t, (0, total - n), constant_values=0.0)
    x2 = x.reshape(rows_pad, _LANES)
    t2 = t.reshape(rows_pad, _LANES)
    grid = (rows_pad // block_rows,)

    kernel = functools.partial(_dice_kernel, smooth=float(smooth))

    out = pl.pallas_call(
        kernel,
        out_shape=jax.ShapeDtypeStruct((1, _LANES), jnp.float32),
        grid_spec=pltpu.PrefetchScalarGridSpec(
            num_scalar_prefetch=0,
            grid=grid,
            in_specs=[
                pl.BlockSpec((block_rows, _LANES), lambda i: (i, 0)),
                pl.BlockSpec((block_rows, _LANES), lambda i: (i, 0)),
            ],
            out_specs=pl.BlockSpec((1, _LANES), lambda i: (0, 0)),
            scratch_shapes=[
                pltpu.VMEM((1, _LANES), jnp.float32),   # intersection partials
                pltpu.VMEM((1, _LANES), jnp.float32),   # sum(p) + sum(t) partials
            ],
        ),
        compiler_params=pltpu.CompilerParams(
            # Single reduction axis with persistent accumulators.
            dimension_semantics=("arbitrary",)),
    )(x2, t2)
    return out[0, 0]


def _ref_dice_loss(inputs, targets, smooth=1.0):
    p = _sigmoid(inputs.astype(jnp.float32)).ravel()
    t = targets.astype(jnp.float32).ravel()
    inter = jnp.sum(p * t)
    dice = (2.0 * inter + smooth) / (jnp.sum(p) + jnp.sum(t) + smooth)
    return 1.0 - dice


if __name__ == "__main__":
    key = jax.random.PRNGKey(0)
    k1, k2 = jax.random.split(key)
    # Logits and binary targets, small shapes consistent with a segmentation loss.
    inputs = jax.random.normal(k1, (2, 1, 16, 16), dtype=jnp.float32)
    targets = (jax.random.uniform(k2, (2, 1, 16, 16)) > 0.5).astype(jnp.float32)

    loss = dice_loss(inputs, targets, smooth=1.0)
    loss = jax.block_until_ready(loss)

    ref = _ref_dice_loss(inputs, targets, smooth=1.0)

    assert loss.shape == (), loss.shape
    assert bool(jnp.isfinite(loss))
    assert bool(jnp.allclose(loss, ref, rtol=1e-5, atol=1e-5)), (loss, ref)
    print("KERNEL_OK")
</pallas_src>

<mosaic_0001>
module attributes {stable_mosaic.version = 11 : i64} {
  func.func @_dice_kernel(%arg0: i32, %arg1: memref<8x128xf32, #tpu.memory_space<vmem>>, %arg2: memref<8x128xf32, #tpu.memory_space<vmem>>, %arg3: memref<1x128xf32, #tpu.memory_space<vmem>>, %arg4: memref<1x128xf32, #tpu.memory_space<vmem>>, %arg5: memref<1x128xf32, #tpu.memory_space<vmem>>) attributes {dimension_semantics = [#tpu.dimension_semantics<arbitrary>], iteration_bounds = array<i64: 1>, scalar_prefetch = 0 : i64, scratch_operands = 2 : i64, tpu.core_type = #tpu.core_type<tc>, window_params = [{transform_indices = @transform_0, window_bounds = array<i64: 8, 128>}, {transform_indices = @transform_1, window_bounds = array<i64: 8, 128>}, {pipeline_mode = #tpu.pipeline_mode<synchronous>, transform_indices = @transform_2, window_bounds = array<i64: 1, 128>}]} {
    %c0_i32 = arith.constant 0 : i32
    %0 = arith.cmpi eq, %arg0, %c0_i32 : i32
    %1 = arith.extui %0 : i1 to i32
    %c0_i32_0 = arith.constant 0 : i32
    %2 = arith.cmpi ne, %1, %c0_i32_0 : i32
    scf.if %2 {
      %cst_18 = arith.constant 0.000000e+00 : f32
      %27 = vector.broadcast %cst_18 : f32 to vector<1x128xf32>
      %c0_19 = arith.constant 0 : index
      %c0_20 = arith.constant 0 : index
      %28 = vector.load %arg4[%c0_19, %c0_20] : memref<1x128xf32, #tpu.memory_space<vmem>>, vector<1x128xf32>
      tpu.vector_store %arg4[%c0_19, %c0_20], %27 {strides = array<i32>} : memref<1x128xf32, #tpu.memory_space<vmem>>, vector<1x128xf32>,
      %cst_21 = arith.constant 0.000000e+00 : f32
      %29 = vector.broadcast %cst_21 : f32 to vector<1x128xf32>
      %c0_22 = arith.constant 0 : index
      %c0_23 = arith.constant 0 : index
      %30 = vector.load %arg5[%c0_22, %c0_23] : memref<1x128xf32, #tpu.memory_space<vmem>>, vector<1x128xf32>
      tpu.vector_store %arg5[%c0_22, %c0_23], %29 {strides = array<i32>} : memref<1x128xf32, #tpu.memory_space<vmem>>, vector<1x128xf32>,
    } else {
    }
    %c0 = arith.constant 0 : index
    %c0_1 = arith.constant 0 : index
    %3 = vector.load %arg1[%c0, %c0_1] : memref<8x128xf32, #tpu.memory_space<vmem>>, vector<8x128xf32>
    %c0_2 = arith.constant 0 : index
    %c0_3 = arith.constant 0 : index
    %4 = vector.load %arg2[%c0_2, %c0_3] : memref<8x128xf32, #tpu.memory_space<vmem>>, vector<8x128xf32>
    %cst = arith.constant 0.000000e+00 : f32
    %5 = vector.broadcast %cst : f32 to vector<8x128xf32>
    %6 = arith.subf %5, %3 : vector<8x128xf32>
    %7 = math.exp %6 : vector<8x128xf32>
    %cst_4 = arith.constant 1.000000e+00 : f32
    %8 = vector.broadcast %cst_4 : f32 to vector<8x128xf32>
    %9 = arith.addf %8, %7 : vector<8x128xf32>
    %cst_5 = arith.constant 1.000000e+00 : f32
    %10 = vector.broadcast %cst_5 : f32 to vector<8x128xf32>
    %11 = arith.divf %10, %9 : vector<8x128xf32>
    %c0_6 = arith.constant 0 : index
    %c0_7 = arith.constant 0 : index
    %12 = vector.load %arg4[%c0_6, %c0_7] : memref<1x128xf32, #tpu.memory_space<vmem>>, vector<1x128xf32>
    %13 = arith.mulf %11, %4 : vector<8x128xf32>
    %cst_8 = arith.constant dense<0.000000e+00> : vector<128xf32>
    %14 = vector.multi_reduction <add>, %13, %cst_8 [0] : vector<8x128xf32> to vector<128xf32>
    %15 = vector.shape_cast %14 : vector<128xf32> to vector<1x128xf32>
    %16 = arith.addf %12, %15 : vector<1x128xf32>
    %c0_9 = arith.constant 0 : index
    %c0_10 = arith.constant 0 : index
    %17 = vector.load %arg4[%c0_9, %c0_10] : memref<1x128xf32, #tpu.memory_space<vmem>>, vector<1x128xf32>
    tpu.vector_store %arg4[%c0_9, %c0_10], %16 {strides = array<i32>} : memref<1x128xf32, #tpu.memory_space<vmem>>, vector<1x128xf32>,
    %c0_11 = arith.constant 0 : index
    %c0_12 = arith.constant 0 : index
    %18 = vector.load %arg5[%c0_11, %c0_12] : memref<1x128xf32, #tpu.memory_space<vmem>>, vector<1x128xf32>
    %19 = arith.addf %11, %4 : vector<8x128xf32>
    %cst_13 = arith.constant dense<0.000000e+00> : vector<128xf32>
    %20 = vector.multi_reduction <add>, %19, %cst_13 [0] : vector<8x128xf32> to vector<128xf32>
    %21 = vector.shape_cast %20 : vector<128xf32> to vector<1x128xf32>
    %22 = arith.addf %18, %21 : vector<1x128xf32>
    %c0_14 = arith.constant 0 : index
    %c0_15 = arith.constant 0 : index
    %23 = vector.load %arg5[%c0_14, %c0_15] : memref<1x128xf32, #tpu.memory_space<vmem>>, vector<1x128xf32>
    tpu.vector_store %arg5[%c0_14, %c0_15], %22 {strides = array<i32>} : memref<1x128xf32, #tpu.memory_space<vmem>>, vector<1x128xf32>,
    %c0_i32_16 = arith.constant 0 : i32
    %24 = arith.cmpi eq, %arg0, %c0_i32_16 : i32
    %25 = arith.extui %24 : i1 to i32
    %c0_i32_17 = arith.constant 0 : i32
    %26 = arith.cmpi ne, %25, %c0_i32_17 : i32
    scf.if %26 {
      %c0_18 = arith.constant 0 : index
      %c0_19 = arith.constant 0 : index
      %27 = vector.load %arg4[%c0_18, %c0_19] : memref<1x128xf32, #tpu.memory_space<vmem>>, vector<1x128xf32>
      %28 = vector.shape_cast %27 : vector<1x128xf32> to vector<1x1x128xf32>
      %cst_20 = arith.constant dense<0.000000e+00> : vector<1xf32>
      %29 = vector.multi_reduction <add>, %28, %cst_20 [1, 2] : vector<1x1x128xf32> to vector<1xf32>
      %30 = vector.shape_cast %29 : vector<1xf32> to vector<1x1x1xf32>
      %31 = vector.extract %30[0, 0, 0] : f32 from vector<1x1x1xf32>
      %c0_21 = arith.constant 0 : index
      %c0_22 = arith.constant 0 : index
      %32 = vector.load %arg5[%c0_21, %c0_22] : memref<1x128xf32, #tpu.memory_space<vmem>>, vector<1x128xf32>
      %33 = vector.shape_cast %32 : vector<1x128xf32> to vector<1x1x128xf32>
      %cst_23 = arith.constant dense<0.000000e+00> : vector<1xf32>
      %34 = vector.multi_reduction <add>, %33, %cst_23 [1, 2] : vector<1x1x128xf32> to vector<1xf32>
      %35 = vector.shape_cast %34 : vector<1xf32> to vector<1x1x1xf32>
      %36 = vector.extract %35[0, 0, 0] : f32 from vector<1x1x1xf32>
      %cst_24 = arith.constant 2.000000e+00 : f32
      %37 = arith.mulf %cst_24, %31 : f32
      %cst_25 = arith.constant 1.000000e+00 : f32
      %38 = arith.addf %37, %cst_25 : f32
      %cst_26 = arith.constant 1.000000e+00 : f32
      %39 = arith.addf %36, %cst_26 : f32
      %40 = arith.divf %38, %39 : f32
      %cst_27 = arith.constant 1.000000e+00 : f32
      %41 = arith.subf %cst_27, %40 : f32
      %42 = vector.broadcast %41 : f32 to vector<1x128xf32>
      %c0_28 = arith.constant 0 : index
      %c0_29 = arith.constant 0 : index
      %43 = vector.load %arg3[%c0_28, %c0_29] : memref<1x128xf32, #tpu.memory_space<vmem>>, vector<1x128xf32>
      tpu.vector_store %arg3[%c0_28, %c0_29], %42 {strides = array<i32>} : memref<1x128xf32, #tpu.memory_space<vmem>>, vector<1x128xf32>,
    } else {
    }
    return
  }
  func.func @transform_0(%arg0: i32) -> (i32, i32) {
    %c0_i32 = arith.constant 0 : i32
    %c0_i32_0 = arith.constant 0 : i32
    return %arg0, %c0_i32 : i32, i32
  }
  func.func @transform_1(%arg0: i32) -> (i32, i32) {
    %c0_i32 = arith.constant 0 : i32
    %c0_i32_0 = arith.constant 0 : i32
    return %arg0, %c0_i32 : i32, i32
  }
  func.func @transform_2(%arg0: i32) -> (i32, i32) {
    %c0_i32 = arith.constant 0 : i32
    %c0_i32_0 = arith.constant 0 : i32
    %c0_i32_1 = arith.constant 0 : i32
    return %c0_i32, %c0_i32_0 : i32, i32
  }
}

</mosaic_0001>

<bundles_post_ra>
// kernel: tpu_custom_call.1
= control target key start
LH: loop header
LB: loop body
LE: loop exit
PB: predicated region body
PF: predicated region fallthrough
CT: control target
= control target key end

     0   :  { %7 = vsyncpa [#allocation5], 0  ;;  %s265_s0 = inlined_call_operand.hbm [shape: f32[8,128], index: 0, kind: input, shape index: {}]   ;;  %s266_s1 = inlined_call_operand.hbm [shape: f32[8,128], index: 1, kind: input, shape index: {}]   ;;  %s267_s2 = inlined_call_operand.hbm [shape: f32[1,128], index: 2, kind: output, shape index: {}]  }
   0x1   :  { %8 = vsyncpa [#allocation8], 0 }
   0x2   :  { %9 = vsyncpa [#allocation6], 0  ;;  %s210_s9 = smov [#allocation4]   ;;  %s211_s11 = smov [#allocation7]  }
   0x3   :  { %s16_s10 = sshll.u32 %s210_s9, 4  ;;  %s26_s12 = sshll.u32 %s211_s11, 4  ;;  %s17_s10 = int_to_ptr.vmem [resolvable:$true] %s16_s10  ;;  %s27_s12 = int_to_ptr.vmem [resolvable:$true] %s26_s12 }
   0x4   :  { %s138_s15 = scalar_lea.hbm %s265_s0, 128 }
   0x5   :  { %p139_p0 = scmp.ne.s32.totalorder %s265_s0, %s138_s15  ;;  %p142_p1 = scmp.lt.u32.totalorder %s138_s15, %s265_s0 }
   0x7   :  { %p144_p2 = pnand %p142_p1, %p139_p0 }
   0x9   :  { %147 = shalt.err (!%p144_p2)
}
   0xa   :  { %s148_s20 = scalar_lea.vmem %s17_s10, 128  ;;  %p153_p4 = scmp.lt.s32.totalorder %s17_s10, %s17_s10 }
   0xb   :  { %p149_p3 = scmp.ne.s32.totalorder %s17_s10, %s148_s20  ;;  %p154_p5 = scmp.lt.s32.totalorder %s148_s20, %s148_s20 }
   0xd   :  { %p155_p6 = por %p154_p5, %p153_p4 }
   0xf   :  { %p156_p7 = pnand %p155_p6, %p149_p3 }
  0x11   :  { %159 = shalt.err (!%p156_p7)
}
  0x12   :  { %19 = dma.hbm_to_vmem [thread:$0]  %s265_s0, 128, %s17_s10, [#allocation5]  }
  0x13   :  { %s160_s25 = scalar_lea.hbm %s266_s1, 128 }
  0x14   :  { %p161_p8 = scmp.ne.s32.totalorder %s266_s1, %s160_s25  ;;  %p164_p9 = scmp.lt.u32.totalorder %s160_s25, %s266_s1 }
  0x16   :  { %p166_p10 = pnand %p164_p9, %p161_p8 }
  0x18   :  { %169 = shalt.err (!%p166_p10)
}
  0x19   :  { %s170_s30 = scalar_lea.vmem %s27_s12, 128  ;;  %p175_p12 = scmp.lt.s32.totalorder %s27_s12, %s27_s12 }
  0x1a   :  { %p171_p11 = scmp.ne.s32.totalorder %s27_s12, %s170_s30  ;;  %p176_p13 = scmp.lt.s32.totalorder %s170_s30, %s170_s30 }
  0x1c   :  { %p177_p0 = por %p176_p13, %p175_p12 }
  0x1e   :  { %p178_p1 = pnand %p177_p0, %p171_p11 }
  0x20   :  { %181 = shalt.err (!%p178_p1)
}
  0x21   :  { %29 = dma.hbm_to_vmem [thread:$0]  %s266_s1, 128, %s27_s12, [#allocation8]  }
  0x22   :  { %204 = dma.done.wait [#allocation5], 128  }
  0x23   :  { %205 = vsyncadd [#allocation5], 4294967168 }
  0x24   :  { %206 = dma.done.wait [#allocation8], 128  }
  0x25   :  { %207 = vsyncadd [#allocation8], 4294967168  ;;  %v212_v0 = vmov 0.0   ;;  %v42_v1 = vld [vmem:[#allocation4] sm:$0xff]  ;;  %v43_v6 = vld [vmem:[#allocation7] sm:$0xff]  ;;  %vm74_vm0 = vcmask 1040384  }
  0x26   :  { %40 = vst [vmem:[#allocation2] sm:$0x1] %v212_v0  ;;  %41 = vst [vmem:[#allocation3] sm:$0x1] %v212_v0  ;;  %v44_v2 = vsub.f32 0.0, %v42_v1  ;;  %s213_s10 = smov [#allocation9]  }
  0x27   :  { %s112_s11 = sshll.u32 %s213_s10, 4  ;;  %s113_s11 = int_to_ptr.vmem [resolvable:$true] %s112_s11 }
  0x28   :  { %v45_v3 = vmul.f32 1.442695, %v44_v2  ;;  %s182_s13 = scalar_lea.vmem %s113_s11, 16  ;;  %s186_s14 = scalar_lea.vmem %s113_s11, 32 }
  0x29   :  { %p183_p2 = scmp.ne.s32.totalorder %s113_s11, %s182_s13  ;;  %p187_p3 = scmp.lt.s32.totalorder %s113_s11, %s113_s11 }
  0x2a   :  { %132 = vpow2.f32 %v45_v3  ;;  %p188_p4 = scmp.lt.s32.totalorder %s186_s14, %s182_s13 }
  0x2c   :  { %p189_p5 = por %p188_p4, %p187_p3 }
  0x2d   :  { %v50_v20 = vld [vmem:[#allocation2] sm:$0x1]  ;;  %v60_v21 = vld [vmem:[#allocation3] sm:$0x1] }
  0x2e   :  { %p190_p6 = pnand %p189_p5, %p183_p2 }
  0x34   :  { %v133_v4 = vpop.eup %132 }
  0x35   :  { %v47_v5 = vadd.f32 1.0, %v133_v4 }
  0x37   :  { %134 = vrcp.f32 %v47_v5 }
  0x41   :  { %v135_v7 = vpop.eup %134 }
  0x42   :  { %v51_v8 = vmul.f32 %v135_v7, %v43_v6  ;;  %v61_v9 = vadd.f32 %v135_v7, %v43_v6 }
  0x44   :  { %v52_v10 = vrot.slane %v51_v8, 4  ;;  %v62_v11 = vrot.slane %v61_v9, 4 }
  0x46   :  { %v53_v12 = vadd.f32 %v52_v10, %v51_v8  ;;  %v63_v13 = vadd.f32 %v62_v11, %v61_v9 }
  0x48   :  { %v54_v14 = vrot.slane %v53_v12, 2  ;;  %v64_v15 = vrot.slane %v63_v13, 2 }
  0x4a   :  { %v55_v16 = vadd.f32 %v54_v14, %v53_v12  ;;  %v65_v17 = vadd.f32 %v64_v15, %v63_v13 }
  0x4c   :  { %v56_v18 = vrot.slane %v55_v16, 1  ;;  %v66_v19 = vrot.slane %v65_v17, 1 }
  0x4e   :  { %v57_v22 = vadd.f32 %v56_v18, %v55_v16  ;;  %v67_v23 = vadd.f32 %v66_v19, %v65_v17 }
  0x50   :  { %v58_v24 = vadd.f32 %v57_v22, %v50_v20  ;;  %v68_v25 = vadd.f32 %v67_v23, %v60_v21 }
  0x52   :  { %59 = vst [vmem:[#allocation2] sm:$0x1] %v58_v24  ;;  %69 = vst [vmem:[#allocation3] sm:$0x1] %v68_v25 }
  0x59   :  { %v73_v26 = vld [vmem:[#allocation2] sm:$0x1]  ;;  %v85_v27 = vld [vmem:[#allocation3] sm:$0x1] }
  0x5a   :  { %v75_v28 = vsel %vm74_vm0, %v73_v26, 0.0  ;;  %v86_v29 = vsel %vm74_vm0, %v85_v27, 0.0 }
  0x5b   :  { %76 = vadd.xlane.f32.xlu0 %v75_v28 }
  0x5f   :  { %87 = vadd.xlane.f32.xlu0 %v86_v29 }
  0xe8   :  { %v77_v30 = vpop.xlane.xlu0 %76 }
  0xe9   :  { %v78_v31 = vrot.slane %v77_v30, 4 }
  0xeb   :  { %v79_v32 = vadd.f32 %v78_v31, %v77_v30 }
  0xec   :  { %v88_v33 = vpop.xlane.xlu0 %87 }
  0xed   :  { %v80_v34 = vrot.slane %v79_v32, 2  ;;  %v89_v35 = vrot.slane %v88_v33, 4 }
  0xef   :  { %v90_v36 = vadd.f32 %v89_v35, %v88_v33  ;;  %v81_v37 = vadd.f32 %v80_v34, %v79_v32 }
  0xf1   :  { %v91_v38 = vrot.slane %v90_v36, 2  ;;  %v82_v39 = vrot.slane %v81_v37, 1 }
  0xf3   :  { %v92_v40 = vadd.f32 %v91_v38, %v90_v36  ;;  %v83_v41 = vadd.f32 %v82_v39, %v81_v37 }
  0xf5   :  { %122 = vpush %v83_v41  ;;  %v93_v42 = vrot.slane %v92_v40, 1 }
  0xf7   :  { %v94_v43 = vadd.f32 %v93_v42, %v92_v40 }
  0xf9   :  { %124 = vpush %v94_v43 }
 0x126   :  { %s123_s1 = spop %122 }
 0x127   :  { %s96_s6 = smul.f32 2.0, %s123_s1 }
 0x129   :  { %s97_s7 = sadd.f32 1.0, %s96_s6 }
 0x12a   :  { %s125_s4 = spop %124 }
 0x12b   :  { %s98_s5 = sadd.f32 1.0, %s125_s4 }
 0x12d   :  { %v99_v44 = vstv %s98_s5 }
 0x12e   :  { %136 = vrcp.f32 %v99_v44 }
 0x138   :  { %v137_v45 = vpop.eup %136 }
 0x139   :  { %126 = vpush %v137_v45 }
 0x16a   :  { %s127_s8 = spop %126 }
 0x16b   :  { %s102_s9 = smul.f32 %s127_s8, %s97_s7 }
 0x16d   :  { %s103_s12 = ssub.f32 1.0, %s102_s9 }
 0x16f   :  { %v104_v46 = vstv %s103_s12 }
 0x170   :  { %105 = vst [vmem:[#allocation9] sm:$0x1] %v104_v46 }
 0x171   :  { %193 = shalt.err (!%p190_p6)
}
 0x172   :  { %s194_s17 = scalar_lea.hbm %s267_s2, 16 }
 0x173   :  { %p195_p7 = scmp.ne.s32.totalorder %s267_s2, %s194_s17  ;;  %p198_p8 = scmp.lt.u32.totalorder %s194_s17, %s267_s2 }
 0x175   :  { %p200_p9 = pnand %p198_p8, %p195_p7 }
 0x177   :  { %203 = shalt.err (!%p200_p9)
}
 0x178   :  { %115 = dma.vmem_to_hbm [thread:$0]  %s113_s11, 16, %s267_s2, [#allocation6]  }
 0x179   :  { %208 = dma.done.wait [#allocation6], 16  }
 0x17a   :  { %209 = vsyncadd [#allocation6], 4294967280 }
 0x17b   :  { %119 = vsyncpa [#allocation5], 1 }
 0x17c   :  { %120 = vsyncpa [#allocation8], 1 }
 0x17d   :  { %121 = vsyncpa [#allocation6], 1 }

</bundles_post_ra>
